<compile_context>
chip_gen: v6e
topology: v6e:2x2x1
jax: 0.10.0
libtpu: 0.0.40
codegen_flags: <defaults>
</compile_context>

<pallas_src>
import functools
import math

import jax
import jax.numpy as jnp
from jax.experimental import pallas as pl
from jax.experimental.pallas import tpu as pltpu


_VMEM_LIMIT_BYTES = 40 * 1024 * 1024  # safe on v5e/v6e (128 MiB) and v7x (64 MiB/TC)


# ----------------------------------------------------------------------------- helpers
def _sublane_mult(dtype):
    """Sublane multiple by dtype packing: f32 -> 8, bf16 -> 16, int8/fp8 -> 32."""
    return {4: 8, 2: 16, 1: 32}.get(jnp.dtype(dtype).itemsize, 8)


def _pick_tile(size, target, mult):
    """Largest divisor of `size` that is <= target and a multiple of `mult`,
    falling back to the full dimension (full-dim blocks are always legal)."""
    if size <= target:
        return size
    t = (target // mult) * mult
    while t >= mult:
        if size % t == 0:
            return t
        t -= mult
    # TODO(synk): indivisible large dims should use a pl.cdiv grid + masked edge tile;
    # full-dim fallback is legal but can exceed the VMEM budget at deploy shapes.
    return size


def _pick_head_group(heads, dim_head, target_lanes=256):
    """Number of heads processed per attention grid step. Chosen so that
    G*dim_head is a multiple of 128 lanes (lane-dense blocks) and <= target_lanes."""
    best = None
    for g in range(1, heads + 1):
        if heads % g:
            continue
        lanes = g * dim_head
        if lanes % 128 == 0 and lanes <= target_lanes:
            best = g
    if best is not None:
        return best
    for g in range(heads, 0, -1):
        if heads % g == 0 and (g * dim_head) % 128 == 0:
            return g
    # TODO(synk): dim_head not reaching a 128-lane multiple needs head-dim padding.
    return heads


# ----------------------------------------------------------------------------- matmul kernels
def _matmul_kernel(a_ref, b_ref, o_ref, acc_ref):
    @pl.when(pl.program_id(2) == 0)
    def _():
        acc_ref[...] = jnp.zeros_like(acc_ref)

    # native-dtype MXU operands, f32 accumulation
    acc_ref[...] += jnp.dot(a_ref[...], b_ref[...], preferred_element_type=jnp.float32)

    @pl.when(pl.program_id(2) == pl.num_programs(2) - 1)
    def _():
        o_ref[...] = acc_ref[...].astype(o_ref.dtype)


def _matmul_bias_kernel(a_ref, b_ref, bias_ref, o_ref, acc_ref):
    @pl.when(pl.program_id(2) == 0)
    def _():
        acc_ref[...] = jnp.zeros_like(acc_ref)

    acc_ref[...] += jnp.dot(a_ref[...], b_ref[...], preferred_element_type=jnp.float32)

    @pl.when(pl.program_id(2) == pl.num_programs(2) - 1)
    def _():
        o_ref[...] = (acc_ref[...] + bias_ref[...].astype(jnp.float32)).astype(o_ref.dtype)


def matmul(a, b, bias=None, *, tm_target=512, tn_target=1024, tk_target=512):
    """a: (M, K), b: (K, N), optional bias: (N,). Returns a @ b (+ bias), dtype of a."""
    M, K = a.shape
    K2, N = b.shape
    assert K == K2, (K, K2)

    tm = _pick_tile(M, tm_target, _sublane_mult(a.dtype))
    tn = _pick_tile(N, tn_target, 128)
    tk = _pick_tile(K, tk_target, 128)
    grid = (M // tm, N // tn, K // tk)

    in_specs = [
        pl.BlockSpec((tm, tk), lambda i, j, k: (i, k)),
        pl.BlockSpec((tk, tn), lambda i, j, k: (k, j)),
    ]
    args = [a, b]
    if bias is None:
        kernel = _matmul_kernel
    else:
        kernel = _matmul_bias_kernel
        in_specs.append(pl.BlockSpec((1, tn), lambda i, j, k: (0, j)))
        args.append(bias.reshape(1, N))

    return pl.pallas_call(
        kernel,
        out_shape=jax.ShapeDtypeStruct((M, N), a.dtype),
        grid_spec=pltpu.PrefetchScalarGridSpec(
            num_scalar_prefetch=0,
            grid=grid,
            in_specs=in_specs,
            out_specs=pl.BlockSpec((tm, tn), lambda i, j, k: (i, j)),
            scratch_shapes=[pltpu.VMEM((tm, tn), jnp.float32)],
        ),
        compiler_params=pltpu.CompilerParams(
            dimension_semantics=("parallel", "parallel", "arbitrary"),
            vmem_limit_bytes=_VMEM_LIMIT_BYTES,
        ),
    )(*args)


# ----------------------------------------------------------------------------- fused attention kernel
def _attention_kernel(q_ref, k_ref, v_ref, o_ref, qs_ref, m_sc, l_sc, acc_sc,
                      *, scale, g_heads, dim_head):
    # q_ref: (tq, G*D); k_ref/v_ref: (tkv, G*D); o_ref: (tq, G*D).
    # G heads are packed along lanes; per-head math uses static 64-lane column slices,
    # while all HBM traffic stays lane-dense (G*D >= 128).
    kv = pl.program_id(3)

    @pl.when(kv == 0)
    def _():
        # q * scale hoisted out of the kv loop: computed once per q tile, native dtype.
        qs_ref[...] = (q_ref[...] * scale).astype(qs_ref.dtype)
        m_sc[...] = jnp.full_like(m_sc, -jnp.inf)
        l_sc[...] = jnp.zeros_like(l_sc)
        acc_sc[...] = jnp.zeros_like(acc_sc)

    q = qs_ref[...]
    k = k_ref[...]
    v = v_ref[...]

    for g in range(g_heads):  # short static loop, unrolled
        c0, c1 = g * dim_head, (g + 1) * dim_head
        qg = q[:, c0:c1]
        kg = k[:, c0:c1]
        vg = v[:, c0:c1]

        # s = qg @ kg^T  (contract the head dim; native-dtype operands, f32 acc)
        s = jax.lax.dot_general(
            qg, kg, (((1,), (1,)), ((), ())), preferred_element_type=jnp.float32
        )  # (tq, tkv)

        m_prev = m_sc[g]
        m_new = jnp.maximum(m_prev, jnp.max(s, axis=-1, keepdims=True))
        alpha = jnp.exp(m_prev - m_new)
        p = jnp.exp(s - m_new)

        l_sc[g] = alpha * l_sc[g] + jnp.sum(p, axis=-1, keepdims=True)
        acc_sc[g] = alpha * acc_sc[g] + jnp.dot(
            p.astype(vg.dtype), vg, preferred_element_type=jnp.float32
        )
        m_sc[g] = m_new

    @pl.when(kv == pl.num_programs(3) - 1)
    def _():
        for g in range(g_heads):
            # exact reciprocal: still on the EUP slot, no accuracy penalty
            inv = pl.reciprocal(l_sc[g])
            o_ref[:, g * dim_head:(g + 1) * dim_head] = (acc_sc[g] * inv).astype(o_ref.dtype)


def multihead_attention_fused(qkv, *, heads, dim_head, scale,
                              tq_target=512, tkv_target=2048, head_group_lanes=256):
    """qkv: (b, n, 3*heads*dim_head) packed [q | k | v] with heads-major columns
    (the 'b n (h d)' layout produced by the to_qkv Linear).
    Returns softmax(q k^T * scale) v already in (b, n, heads*dim_head) layout."""
    b, n, inner3 = qkv.shape
    inner = inner3 // 3
    assert inner == heads * dim_head, (inner, heads, dim_head)

    g = _pick_head_group(heads, dim_head, target_lanes=head_group_lanes)
    nhg = heads // g
    gd = g * dim_head

    mult = _sublane_mult(qkv.dtype)
    tq = _pick_tile(n, tq_target, mult)
    tkv = _pick_tile(n, tkv_target, mult)
    grid = (b, nhg, n // tq, n // tkv)   # batch outermost (parallel) for v7x 2-TC sharding

    kernel = functools.partial(_attention_kernel, scale=scale, g_heads=g, dim_head=dim_head)
    return pl.pallas_call(
        kernel,
        out_shape=jax.ShapeDtypeStruct((b, n, inner), qkv.dtype),
        grid_spec=pltpu.PrefetchScalarGridSpec(
            num_scalar_prefetch=0,
            grid=grid,
            in_specs=[
                # q / k / v read straight from the packed qkv buffer via column-offset
                # block indices (no jnp.split, no head transposes).
                pl.BlockSpec((None, tq, gd), lambda bi, hg, qi, kj: (bi, qi, hg)),
                pl.BlockSpec((None, tkv, gd), lambda bi, hg, qi, kj: (bi, kj, nhg + hg)),
                pl.BlockSpec((None, tkv, gd), lambda bi, hg, qi, kj: (bi, kj, 2 * nhg + hg)),
            ],
            out_specs=pl.BlockSpec((None, tq, gd), lambda bi, hg, qi, kj: (bi, qi, hg)),
            scratch_shapes=[
                pltpu.VMEM((tq, gd), qkv.dtype),             # q * scale (per q tile)
                pltpu.VMEM((g, tq, 1), jnp.float32),         # running max (per head)
                pltpu.VMEM((g, tq, 1), jnp.float32),         # running denom (per head)
                pltpu.VMEM((g, tq, dim_head), jnp.float32),  # f32 output accumulator
            ],
        ),
        compiler_params=pltpu.CompilerParams(
            dimension_semantics=("parallel", "parallel", "parallel", "arbitrary"),
            vmem_limit_bytes=_VMEM_LIMIT_BYTES,
        ),
    )(qkv, qkv, qkv)


# ----------------------------------------------------------------------------- full forward
def attention_forward(x, w_qkv, w_out, b_out, *, heads, mask=None):
    """x: (b, n, dim); w_qkv: (dim, 3*inner); w_out: (inner, dim); b_out: (dim,).
    Weights are stored pre-transposed ((in, out) layout == torch weight .T)."""
    if mask is not None:
        # TODO(synk): masked attention path (F.pad(mask,(1,0)) + outer-product bool mask) not implemented.
        raise NotImplementedError("mask is not supported")

    b, n, dim = x.shape
    inner3 = w_qkv.shape[1]
    inner = inner3 // 3
    dim_head = inner // heads
    scale = dim ** (-0.5)  # the torch module scales by model dim (not dim_head); keep spec semantics

    x2 = x.reshape(b * n, dim)
    qkv = matmul(x2, w_qkv)                      # bias-free to_qkv (no zero-bias stream)
    qkv3 = qkv.reshape(b, n, inner3)             # free reshape, no transpose passes

    o = multihead_attention_fused(qkv3, heads=heads, dim_head=dim_head, scale=scale)  # (b, n, inner)

    out = matmul(o.reshape(b * n, inner), w_out, b_out)  # to_out Linear; Dropout(p=0.0) identity
    return out.reshape(b, n, dim)


# ----------------------------------------------------------------------------- demo / check
if __name__ == "__main__":
    key = jax.random.PRNGKey(0)
    batch, seq, dim = 2, 8, 32
    heads, dim_head = 8, 64
    inner = heads * dim_head

    k1, k2, k3, k4 = jax.random.split(key, 4)
    x = jax.random.normal(k1, (batch, seq, dim), dtype=jnp.float32)
    # deterministic "Linear" weights in (in, out) layout (== torch weight transposed)
    w_qkv = jax.random.normal(k2, (dim, 3 * inner), dtype=jnp.float32) / math.sqrt(dim)
    w_out = jax.random.normal(k3, (inner, dim), dtype=jnp.float32) / math.sqrt(inner)
    b_out = jax.random.normal(k4, (dim,), dtype=jnp.float32) * 0.01

    y = attention_forward(x, w_qkv, w_out, b_out, heads=heads)
    y = jax.block_until_ready(y)

    # Pure-JAX reference (same math as the torch module with mask=None, dropout=0)
    qkv_r = x.reshape(batch * seq, dim) @ w_qkv
    q_r, k_r, v_r = jnp.split(qkv_r, 3, axis=-1)

    def heads_r(t):
        return t.reshape(batch, seq, heads, dim_head).transpose(0, 2, 1, 3)

    qh, kh, vh = heads_r(q_r), heads_r(k_r), heads_r(v_r)
    dots = jnp.einsum("bhid,bhjd->bhij", qh, kh) * (dim ** (-0.5))
    attn = jax.nn.softmax(dots, axis=-1)
    out_r = jnp.einsum("bhij,bhjd->bhid", attn, vh)
    out_r = out_r.transpose(0, 2, 1, 3).reshape(batch * seq, inner)
    y_ref = (out_r @ w_out + b_out).reshape(batch, seq, dim)

    # tolerance covers default-precision f32 MXU rounding (same on both sides)
    assert jnp.allclose(y, y_ref, atol=2e-2, rtol=2e-2), (
        "mismatch vs reference: max abs err = %s" % float(jnp.max(jnp.abs(y - y_ref)))
    )

    print("KERNEL_OK")
</pallas_src>

<mosaic_0001>
module attributes {stable_mosaic.version = 11 : i64} {
  func.func @_matmul_kernel(%arg0: i32, %arg1: i32, %arg2: i32, %arg3: memref<16x32xf32, #tpu.memory_space<vmem>>, %arg4: memref<32x768xf32, #tpu.memory_space<vmem>>, %arg5: memref<16x768xf32, #tpu.memory_space<vmem>>, %arg6: memref<16x768xf32, #tpu.memory_space<vmem>>) attributes {dimension_semantics = [#tpu.dimension_semantics<parallel>, #tpu.dimension_semantics<parallel>, #tpu.dimension_semantics<arbitrary>], iteration_bounds = array<i64: 1, 2, 1>, scalar_prefetch = 0 : i64, scratch_operands = 1 : i64, tpu.core_type = #tpu.core_type<tc>, window_params = [{transform_indices = @transform_0, window_bounds = array<i64: 16, 32>}, {transform_indices = @transform_1, window_bounds = array<i64: 32, 768>}, {transform_indices = @transform_2, window_bounds = array<i64: 16, 768>}]} {
    %c0_i32 = arith.constant 0 : i32
    %0 = arith.cmpi eq, %arg2, %c0_i32 : i32
    %1 = arith.extui %0 : i1 to i32
    %c0_i32_0 = arith.constant 0 : i32
    %2 = arith.cmpi ne, %1, %c0_i32_0 : i32
    scf.if %2 {
      %cst_10 = arith.constant 0.000000e+00 : f32
      %12 = vector.broadcast %cst_10 : f32 to vector<16x768xf32>
      %c0_11 = arith.constant 0 : index
      %c0_12 = arith.constant 0 : index
      %13 = vector.load %arg6[%c0_11, %c0_12] : memref<16x768xf32, #tpu.memory_space<vmem>>, vector<16x768xf32>
      tpu.vector_store %arg6[%c0_11, %c0_12], %12 {strides = array<i32>} : memref<16x768xf32, #tpu.memory_space<vmem>>, vector<16x768xf32>,
    } else {
    }
    %c0 = arith.constant 0 : index
    %c0_1 = arith.constant 0 : index
    %3 = vector.load %arg6[%c0, %c0_1] : memref<16x768xf32, #tpu.memory_space<vmem>>, vector<16x768xf32>
    %c0_2 = arith.constant 0 : index
    %c0_3 = arith.constant 0 : index
    %4 = vector.load %arg3[%c0_2, %c0_3] : memref<16x32xf32, #tpu.memory_space<vmem>>, vector<16x32xf32>
    %c0_4 = arith.constant 0 : index
    %c0_5 = arith.constant 0 : index
    %5 = vector.load %arg4[%c0_4, %c0_5] : memref<32x768xf32, #tpu.memory_space<vmem>>, vector<32x768xf32>
    %cst = arith.constant dense<0.000000e+00> : vector<16x768xf32>
    %6 = tpu.matmul %4, %5, %cst {dimension_numbers = #tpu.dot_dimension_numbers<[1], [0], [0], [1], [0, 0, 1, 1], [], []>} : vector<16x32xf32>, vector<32x768xf32>, vector<16x768xf32> -> vector<16x768xf32>
    %7 = arith.addf %3, %6 : vector<16x768xf32>
    %c0_6 = arith.constant 0 : index
    %c0_7 = arith.constant 0 : index
    %8 = vector.load %arg6[%c0_6, %c0_7] : memref<16x768xf32, #tpu.memory_space<vmem>>, vector<16x768xf32>
    tpu.vector_store %arg6[%c0_6, %c0_7], %7 {strides = array<i32>} : memref<16x768xf32, #tpu.memory_space<vmem>>, vector<16x768xf32>,
    %c0_i32_8 = arith.constant 0 : i32
    %9 = arith.cmpi eq, %arg2, %c0_i32_8 : i32
    %10 = arith.extui %9 : i1 to i32
    %c0_i32_9 = arith.constant 0 : i32
    %11 = arith.cmpi ne, %10, %c0_i32_9 : i32
    scf.if %11 {
      %c0_10 = arith.constant 0 : index
      %c0_11 = arith.constant 0 : index
      %12 = vector.load %arg6[%c0_10, %c0_11] : memref<16x768xf32, #tpu.memory_space<vmem>>, vector<16x768xf32>
      %c0_12 = arith.constant 0 : index
      %c0_13 = arith.constant 0 : index
      %13 = vector.load %arg5[%c0_12, %c0_13] : memref<16x768xf32, #tpu.memory_space<vmem>>, vector<16x768xf32>
      tpu.vector_store %arg5[%c0_12, %c0_13], %12 {strides = array<i32>} : memref<16x768xf32, #tpu.memory_space<vmem>>, vector<16x768xf32>,
    } else {
    }
    return
  }
  func.func @transform_0(%arg0: i32, %arg1: i32, %arg2: i32) -> (i32, i32) {
    %c0_i32 = arith.constant 0 : i32
    return %arg0, %arg2 : i32, i32
  }
  func.func @transform_1(%arg0: i32, %arg1: i32, %arg2: i32) -> (i32, i32) {
    %c0_i32 = arith.constant 0 : i32
    return %arg2, %arg1 : i32, i32
  }
  func.func @transform_2(%arg0: i32, %arg1: i32, %arg2: i32) -> (i32, i32) {
    %c0_i32 = arith.constant 0 : i32
    return %arg0, %arg1 : i32, i32
  }
}

</mosaic_0001>

<bundles_post_ra>
// kernel: tpu_custom_call.1
= control target key start
LH: loop header
LB: loop body
LE: loop exit
PB: predicated region body
PF: predicated region fallthrough
CT: control target
= control target key end

     0   :  { %7 = vsyncpa [#allocation4], 0  ;;  %s1186_s0 = inlined_call_operand.hbm [shape: f32[16,32], index: 0, kind: input, shape index: {}]   ;;  %s1187_s1 = inlined_call_operand.hbm [shape: f32[32,1536], index: 1, kind: input, shape index: {}]   ;;  %s1188_s2 = inlined_call_operand.hbm [shape: f32[16,1536], index: 2, kind: output, shape index: {}]  }
   0x1   :  { %8 = vsyncpa [#allocation7], 0 }
   0x2   :  { %10 = vsyncpa [#allocation7 + $0x1], 0 }
   0x3   :  { %11 = vsyncpa [#allocation5], 0 }
   0x4   :  { %13 = vsyncpa [#allocation5 + $0x1], 0  ;;  %s964_s9 = smov 0   ;;  %s966_s10 = smov 0  }
   0x5   :  { %s968_s11 = smov 0   ;;  %s970_s12 = smov 0  }
   0x6   :  { %s972_s13 = smov 0   ;;  %s974_s14 = smov 0  }
   0x7 LB: > { %1196 = sst [smem:[#allocation12_spill]] %s935_s14  ;;  %s685_s15 = sadd.s32 4294967295, %s935_s14   ;;  %s935_s14 = sphi %s974_s14, %s19_s14   ;;  %s931_s13 = sphi %s972_s13, %s1219_s13   ;;  %s927_s12 = sphi %s970_s12, %s1218_s12   ;;  %s923_s11 = sphi %s968_s11, %s1217_s11   ;;  %s919_s10 = sphi %s966_s10, %s1216_s10   ;;  %s915_s9 = sphi %s964_s9, %s1215_s9  }
   0x8   : > { %s686_s16 = sadd.s32 4294967294, %s935_s14   ;;  %p82_p0 = scmp.ne.s32.totalorder %s923_s11, %s919_s10 }
   0x9   : > { %p83_p1 = scmp.eq.s32.totalorder %s935_s14, 0  ;;  %p88_p2 = scmp.ne.s32.totalorder %s919_s10, %s915_s9 }
   0xa   : > { %p1002_p3 = scmp.eq.s32.totalorder %s685_s15, 0  ;;  %p114_p4 = scmp.eq.s32.totalorder %s685_s15, 1 }
   0xb   : > { %p1006_p5 = por %p83_p1, %p82_p0  ;;  %p120_p6 = scmp.eq.s32.totalorder %s686_s16, 1 }
   0xc   : > { %s1197_s18 = scalar_select %p1002_p3, 1, 0 }
   0xd   : > { %p1012_p7 = por %p1002_p3, %p88_p2  ;;  %p1016_p8 = por %p114_p4, %p82_p0 }
   0xe   : > { %p1020_p9 = por %p120_p6, %p88_p2  ;;  %p687_p10 = scmp.ge.s32.totalorder %s935_s14, 1 }
   0xf   : > { %s1199_s20 = scalar_select %p1012_p7, 1, 0 }
  0x10   : > { %s1200_s21 = scalar_select %p1016_p8, 1, 0 }
  0x11   : > { %s1201_s22 = scalar_select %p1020_p9, 1, 0 }
  0x12   : > { %p127_p11 = scmp.lt.s32.totalorder %s935_s14, 3  ;;  %s937_s24 = smov [#allocation3]  }
  0x13   : > { %1202 = sst [smem:[#allocation13_spill]] %s1201_s22  ;;  %s143_s25 = sshll.u32 %s937_s24, 4  ;;  %s144_s25 = int_to_ptr.vmem [resolvable:$true] %s143_s25 }
  0x14   : > { %p1026_p12 = pnand %p687_p10, %p127_p11  ;;  %p736_p1 = scmp.lt.s32.totalorder %s935_s14, 2 }
  0x15   : > { %s34_s28 = sadd.s32 1, %s931_s13  ;;  %s808_s30 = scalar_lea.vmem %s144_s25, 256 }
  0x16   : > { %p723_p13 = pneg %p1026_p12  ;;  %p1042_p2 = pnand %p736_p1, %p1006_p5 }
  0x17   : > { %p1047_p6 = scmp.ge.s32.totalorder %s34_s28, 2  ;;  %p809_p11 = scmp.ne.s32.totalorder %s144_s25, %s808_s30 }
  0x18   : > { %p1036_p4 = pnand %p723_p13, %p1002_p3  ;;  %p816_p9 = scmp.lt.s32.totalorder %s144_s25, %s144_s25 }
  0x19   : > { %p817_p8 = scmp.lt.s32.totalorder %s808_s30, %s808_s30 }
  0x1a   : > { %p799_p10 = pneg %p1036_p4 }
  0x1b   : > { %p818_p7 = por %p817_p8, %p816_p9 }
  0x1c   : > { %p811_p0 = pnand %p809_p11, %p799_p10 }
  0x1e   : > { %p812_p13 = pneg %p811_p0 }
  0x20   : > { %p819_p3 = pnand %p818_p7, %p812_p13 }
  0x22   : > { %822 = shalt.err (!%p819_p3)
}
  0x23   : > { %s938_s3 = smov 128   ;;  %s939_s4 = smov 8  }
  0x24   : > { %726 = dma.hbm_to_vmem [thread:$0]  (!%p1036_p4), %s1186_s0, 256, %s144_s25, [#allocation4], %s938_s3, %s938_s3, %s939_s4  }
  0x25   : > { %s157_s7 = sand.u32 1, %s923_s11   ;;  %s1221_s28 = smov (%p1047_p6, %s34_s28), 0 }
  0x26   : > { %s712_s8 = smul.u32 192, %s157_s7  ;;  %s71_s15 = ssub.s32 %s931_s13, %s1221_s28 }
  0x27   : > { %s702_s16 = smul.u32 768, %s931_s13  ;;  %p73_p3 = scmp.eq.s32.totalorder %s71_s15, 0 }
  0x28   : > { %s161_s17 = scalar_lea.vmem [#allocation6], %s712_s8  ;;  %s1207_s26 = sadd.s32 1, %s923_s11 }
  0x29   : > { %s170_s30 = scalar_lea.hbm %s1187_s1, %s702_s16  ;;  %s171_s14 = sshll.u32 %s161_s17, 4  ;;  %s172_s14 = int_to_ptr.vmem [resolvable:$true] %s171_s14 }
  0x2a   : > { %s1072_s22 = scalar_select %p73_p3, %s923_s11, %s1207_s26  }
  0x2b   : > { %s158_s25 = scalar_lea.sflag [#allocation7], %s157_s7  ;;  %p825_p5 = pneg %p1042_p2 }
  0x2c   : > { %s836_s29 = scalar_lea.vmem %s172_s14, 3072  ;;  %s940_s3 = smov [#allocation6]  }
  0x2d   : > { %p837_p7 = scmp.ne.s32.totalorder %s172_s14, %s836_s29  ;;  %s841_s4 = sshll.u32 %s940_s3, 4  ;;  %s842_s4 = int_to_ptr.vmem [resolvable:$false] %s841_s4 }
  0x2e   : > { %s843_s5 = scalar_lea.vmem %s842_s4, 6144  ;;  %p844_p0 = scmp.lt.s32.totalorder %s172_s14, %s842_s4 }
  0x2f   : > { %p839_p8 = pnand %p837_p7, %p825_p5  ;;  %p845_p1 = scmp.lt.s32.totalorder %s843_s5, %s836_s29 }
  0x31   : > { %p840_p9 = pneg %p839_p8  ;;  %p846_p4 = por %p845_p1, %p844_p0 }
  0x33   : > { %p847_p6 = pnand %p846_p4, %p840_p9 }
  0x35   : > { %850 = shalt.err (!%p847_p6)
}
  0x36   : > { %s941_s17 = smov 1536   ;;  %s942_s6 = smov 768  }
  0x37   : > { %s943_s8 = smov 48   ;;  %183 = sbr.rel (%p1026_p12) target bundleno = 298 (0x12a), region = 28 }
  0x38   : > { %730 = dma.hbm_to_vmem [thread:$0]  (!%p1042_p2), %s170_s30, 3072, %s172_s14, %s158_s25, %s941_s17, %s942_s6, %s943_s8  }
  0x39   : > { %p1208_p10 = scmp.ne.s32.totalorder (!%p1026_p12), %s1197_s18, 0 }
  0x3c   : > { %902 = dma.done.wait (%p1208_p10), [#allocation4], 256  }
  0x3d   : > { %904 = vsyncadd (%p1208_p10), [#allocation4], 4294967040  ;;  %s1085_s7 = sand.u32 1, %s919_s10   ;;  %p1209_p2 = scmp.ne.s32.totalorder %s1199_s20, 0 }
  0x3e   : > { %s713_s15 = smul.u32 192, %s1085_s7  ;;  %s190_s16 = scalar_lea.sflag [#allocation7], %s1085_s7 }
  0x40   : > { %s1089_s19 = scalar_lea.vmem [#allocation6], %s713_s15 }
  0x41   : > { %906 = dma.done.wait (%p1209_p2), %s190_s16, 3072  }
  0x42   : > { %908 = vsyncadd (%p1209_p2), %s190_s16, 4294964224  ;;  %v944_v0 = vmov 0.0   ;;  %v268_v1 = vld [vmem:[%s1089_s19 + $0x98] sm:$0xff]  ;;  %v270_v2 = vld [vmem:[%s1089_s19 + $0xa8] sm:$0xff]  ;;  %vm273_vm0 = vcmask 261120   ;;  %s714_s14 = smul.u32 96, %s1085_s7 }
  0x43   : > { %344 = vmatprep.mubr.f32.mxu0 %v944_v0  ;;  %421 = vmatprep.mubr.f32.mxu1 %v944_v0  ;;  %v267_v3 = vld [vmem:[%s1089_s19 + $0x90] sm:$0xff]  ;;  %v269_v4 = vld [vmem:[%s1089_s19 + $0xa0] sm:$0xff]  ;;  %v262_v5 = vld [vmem:[%s1089_s19 + $0x68] sm:$0xff]  ;;  %s703_s23 = smul.u32 768, %s927_s12  ;;  %s563_s12 = scalar_lea.sflag [#allocation5], %s1085_s7 }
  0x44   : > { %304 = vmatprep.subr.mxu0 %v268_v1  ;;  %381 = vmatprep.subr.mxu1 %v270_v2  ;;  %v264_v6 = vld [vmem:[%s1089_s19 + $0x78] sm:$0xff]  ;;  %v261_v7 = vld [vmem:[%s1089_s19 + $0x60] sm:$0xff]  ;;  %v263_v8 = vld [vmem:[%s1089_s19 + $0x70] sm:$0xff]  ;;  %s213_s18 = scalar_lea.vmem [#allocation8], %s714_s14  ;;  %p1210_p11 = scmp.ne.s32.totalorder %s1200_s21, 0 }
  0x45   : > { %305 = vmatpush1.msra.mxu0 %v267_v3  ;;  %382 = vmatpush1.msra.mxu1 %v269_v4  ;;  %v256_v9 = vld [vmem:[%s1089_s19 + $0x38] sm:$0xff]  ;;  %v258_v10 = vld [vmem:[%s1089_s19 + $0x48] sm:$0xff]  ;;  %v255_v11 = vld [vmem:[%s1089_s19 + $0x30] sm:$0xff]  ;;  %s579_s20 = sshll.u32 %s213_s18, 4  ;;  %s1138_s30 = scalar_lea.hbm %s1188_s2, %s703_s23  ;;  %s1133_s20 = int_to_ptr.vmem [resolvable:$true] %s579_s20 }
  0x46   : > { %306 = vmatprep.subr.mxu0 %v262_v5  ;;  %383 = vmatprep.subr.mxu1 %v264_v6  ;;  %v257_v12 = vld [vmem:[%s1089_s19 + $0x40] sm:$0xff]  ;;  %v250_v13 = vld [vmem:[%s1089_s19 + $0x8] sm:$0xff]  ;;  %v252_v14 = vld [vmem:[%s1089_s19 + $0x18] sm:$0xff]  ;;  %s851_s26 = scalar_lea.vmem %s1133_s20, 1536  ;;  %s945_s25 = smov [#allocation8]  }
  0x47   : > { %307 = vmatpush1.msra.mxu0 %v261_v7  ;;  %384 = vmatpush1.msra.mxu1 %v263_v8  ;;  %v249_v15 = vld [vmem:[%s1089_s19] sm:$0xff]  ;;  %v251_v16 = vld [vmem:[%s1089_s19 + $0x10] sm:$0xff]  ;;  %v272_v18 = vld [vmem:[%s1089_s19 + $0xb8] sm:$0xff]  ;;  %p852_p12 = scmp.ne.s32.totalorder %s1133_s20, %s851_s26  ;;  %s855_s29 = sshll.u32 %s945_s25, 4  ;;  %s856_s29 = int_to_ptr.vmem [resolvable:$false] %s855_s29 }
  0x48   : > { %308 = vmatprep.subr.mxu0 %v256_v9  ;;  %385 = vmatprep.subr.mxu1 %v258_v10  ;;  %v247_v17 = vld [vmem:[#allocation3] sm:$0xff]  ;;  %v266_v20 = vld [vmem:[%s1089_s19 + $0x88] sm:$0xff]  ;;  %v265_v21 = vld [vmem:[%s1089_s19 + $0x80] sm:$0xff]  ;;  %s857_s3 = scalar_lea.vmem %s856_s29, 3072  ;;  %p858_p5 = scmp.lt.s32.totalorder %s1133_s20, %s856_s29 }
  0x49   : > { %309 = vmatpush1.msra.mxu0 %v255_v11  ;;  %386 = vmatpush1.msra.mxu1 %v257_v12  ;;  %v271_v19 = vld [vmem:[%s1089_s19 + $0xb0] sm:$0xff]  ;;  %v248_v22 = vld [vmem:[#allocation3 + $0x8] sm:$0xff]  ;;  %v254_v25 = vld [vmem:[%s1089_s19 + $0x28] sm:$0xff]  ;;  %p853_p13 = pnand %p852_p12, %p1210_p11  ;;  %p859_p7 = scmp.lt.s32.totalorder %s857_s3, %s851_s26 }
  0x4a   : > { %310 = vmatprep.subr.mxu0 %v250_v13  ;;  %387 = vmatprep.subr.mxu1 %v252_v14  ;;  %v260_v23 = vld [vmem:[%s1089_s19 + $0x58] sm:$0xff]  ;;  %v259_v24 = vld [vmem:[%s1089_s19 + $0x50] sm:$0xff]  ;;  %v253_v26 = vld [vmem:[%s1089_s19 + $0x20] sm:$0xff] }
  0x4b   : > { %311 = vmatpush1.msra.mxu0 %v249_v15  ;;  %388 = vmatpush1.msra.mxu1 %v251_v16  ;;  %p854_p3 = pneg %p853_p13  ;;  %p860_p8 = por %p859_p7, %p858_p5 }
  0x4c   : > { %693 = vmatmul.mubr.msk.f32.vlgmr.msra.gmra.mxu0 %vm273_vm0, %v247_v17  ;;  %695 = vmatmul.mubr.msk.f32.vlgmr.msra.gmra.mxu1 %vm273_vm0, %v247_v17 }
  0x4d   : > { %458 = vmatprep.subr.mxu0 %v272_v18  ;;  %704 = vmatprep.subr.mxu1 %v272_v18  ;;  %p861_p9 = pnand %p860_p8, %p854_p3 }
  0x4e   : > { %459 = vmatpush1.msra.mxu0 %v271_v19  ;;  %708 = vmatpush1.msra.mxu1 %v271_v19 }
  0x4f   : > { %460 = vmatprep.subr.mxu0 %v266_v20  ;;  %705 = vmatprep.subr.mxu1 %v266_v20 }
  0x50   : > { %350 = vmatprep.mubr.f32.mxu0 %v944_v0  ;;  %427 = vmatprep.mubr.f32.mxu1 %v944_v0 }
  0x51   : > { %461 = vmatpush1.msra.mxu0 %v265_v21  ;;  %709 = vmatpush1.msra.mxu1 %v265_v21 }
  0x52   : > { %694 = vmatmul.mubr.msk.f32.gmra.mxu0 %vm273_vm0, %v248_v22  ;;  %696 = vmatmul.mubr.msk.f32.gmra.mxu1 %vm273_vm0, %v248_v22 }
  0x53   : > { %462 = vmatprep.subr.mxu0 %v260_v23  ;;  %706 = vmatprep.subr.mxu1 %v260_v23 }
  0x54   : > { %463 = vmatpush1.msra.mxu0 %v259_v24  ;;  %710 = vmatpush1.msra.mxu1 %v259_v24 }
  0x55   : > { %464 = vmatprep.subr.mxu0 %v254_v25  ;;  %707 = vmatprep.subr.mxu1 %v254_v25 }
  0x56   : > { %465 = vmatpush1.msra.mxu0 %v253_v26  ;;  %711 = vmatpush1.msra.mxu1 %v253_v26 }
  0x57   : > { %498 = vmatprep.mubr.f32.mxu0 %v944_v0  ;;  %504 = vmatprep.mubr.f32.mxu1 %v944_v0 }
  0x58   : > { %697 = vmatmul.mubr.msk.f32.vlgmr.msra.gmra.mxu0 %vm273_vm0, %v247_v17  ;;  %698 = vmatmul.mubr.msk.f32.vlgmr.msra.gmra.mxu1 %vm273_vm0, %v248_v22 }
 0x10c   : > { %v346_v27 = vpop.f32.mrf.mxu0  ;;  %v423_v28 = vpop.f32.mrf.mxu1 }
 0x10d   : > { %550 = vst [vmem:[%s213_s18] sm:$0xff] %v346_v27  ;;  %552 = vst [vmem:[%s213_s18 + $0x10] sm:$0xff] %v423_v28 }
 0x10e   : > { %v348_v29 = vpop.f32.mrf.mxu0  ;;  %v425_v30 = vpop.f32.mrf.mxu1 }
 0x10f   : > { %551 = vst [vmem:[%s213_s18 + $0x8] sm:$0xff] %v348_v29  ;;  %553 = vst [vmem:[%s213_s18 + $0x18] sm:$0xff] %v425_v30 }
 0x112   : > { %v352_v31 = vpop.f32.mrf.mxu0  ;;  %v429_v32 = vpop.f32.mrf.mxu1 }
 0x113   : > { %556 = vst [vmem:[%s213_s18 + $0x30] sm:$0xff] %v352_v31  ;;  %558 = vst [vmem:[%s213_s18 + $0x40] sm:$0xff] %v429_v32 }
 0x114   : > { %v354_v33 = vpop.f32.mrf.mxu0  ;;  %v431_v34 = vpop.f32.mrf.mxu1 }
 0x115   : > { %557 = vst [vmem:[%s213_s18 + $0x38] sm:$0xff] %v354_v33  ;;  %559 = vst [vmem:[%s213_s18 + $0x48] sm:$0xff] %v431_v34 }
 0x118   : > { %v500_v35 = vpop.f32.mrf.mxu0  ;;  %v506_v36 = vpop.f32.mrf.mxu1 }
 0x119   : > { %554 = vst [vmem:[%s213_s18 + $0x20] sm:$0xff] %v500_v35  ;;  %560 = vst [vmem:[%s213_s18 + $0x50] sm:$0xff] %v506_v36 }
 0x11a   : > { %v502_v37 = vpop.f32.mrf.mxu0  ;;  %v508_v38 = vpop.f32.mrf.mxu1 }
 0x11b   : > { %555 = vst [vmem:[%s213_s18 + $0x28] sm:$0xff] %v502_v37  ;;  %561 = vst [vmem:[%s213_s18 + $0x58] sm:$0xff] %v508_v38 }
 0x11c   : > { %864 = shalt.err (!%p861_p9)
}
 0x11d   : > { %s865_s4 = scalar_lea.hbm %s1138_s30, 1536  ;;  %s869_s6 = scalar_lea.hbm %s1188_s2, 3072 }
 0x11e   : > { %p866_p0 = scmp.ne.s32.totalorder %s1138_s30, %s865_s4  ;;  %p870_p6 = scmp.lt.s32.totalorder %s1138_s30, %s1188_s2 }
 0x11f   : > { %p871_p10 = scmp.lt.s32.totalorder %s869_s6, %s865_s4 }
 0x120   : > { %p867_p1 = pnand %p866_p0, %p1210_p11 }
 0x121   : > { %p872_p2 = por %p871_p10, %p870_p6 }
 0x122   : > { %p868_p4 = pneg %p867_p1 }
 0x124   : > { %p873_p12 = pnand %p872_p2, %p868_p4 }
 0x126   : > { %876 = shalt.err (!%p873_p12)
}
 0x127   : > { %s946_s16 = smov 768   ;;  %s947_s19 = smov 1536  }
 0x128   : > { %s948_s14 = smov 48  }
 0x129   : > { %721 = dma.vmem_to_hbm [thread:$0]  (%p1210_p11), %s1133_s20, 1536, %s1138_s30, %s563_s12, %s946_s16, %s947_s19, %s948_s14  }
 0x12a PF: > { %s1211_s18 = sld [smem:[#allocation13_spill]]  ;;  %s594_s27 = sand.u32 1, %s915_s9  }
 0x12b   : > { %s1212_s23 = sld [smem:[#allocation12_spill]]  ;;  %s595_s24 = scalar_lea.sflag [#allocation5], %s594_s27 }
 0x130   : > { %p1213_p13 = scmp.ne.s32.totalorder %s1211_s18, 0 }
 0x131   : > { %p1214_p3 = scmp.ge.s32.totalorder %s1212_s23, 2 }
 0x133   : > { %p732_p5 = pnand %p1214_p3, %p1213_p13 }
 0x135   : > { %p733_p7 = pneg %p732_p5 }
 0x137   : > { %910 = dma.done.wait (%p733_p7), %s595_s24, 1536  }
 0x138   : > { %912 = vsyncadd (%p733_p7), %s595_s24, 4294965760  ;;  %s19_s14 = sadd.s32 1, %s1212_s23   ;;  %s1215_s9 = smov %s919_s10 }
 0x139   : > { %p16_p8 = scmp.ge.s32.totalorder %s19_s14, 4   ;;  %s1216_s10 = smov %s923_s11 }
 0x13a   : > { %s1217_s11 = smov %s1072_s22  ;;  %s1218_s12 = smov %s931_s13 }
 0x13b   : > { %s1219_s13 = smov %s1221_s28  ;;  %18 = sbr.rel (!%p16_p8) target bundleno = 7 (0x7), region = 87 }
 0x140   :  { %600 = vsyncpa [#allocation4], 1 }
 0x141   :  { %602 = vsyncpa [#allocation4 + $0x1], 1 }
 0x142   :  { %603 = vsyncpa [#allocation7], 1 }
 0x143   :  { %605 = vsyncpa [#allocation7 + $0x1], 1 }
 0x144   :  { %606 = vsyncpa [#allocation5], 1 }
 0x145   :  { %608 = vsyncpa [#allocation5 + $0x1], 1 }

</bundles_post_ra>
